<compile_context>
chip_gen: v7x
topology: tpu7x:2x2x1
jax: 0.10.0
libtpu: 0.0.40
codegen_flags: <defaults>
</compile_context>

<pallas_src>
import functools

import jax
import jax.numpy as jnp
from jax.experimental import pallas as pl
from jax.experimental.pallas import tpu as pltpu

LANES = 128
SUBLANES = 8
VREG_ELEMS = SUBLANES * LANES          # 1024 elements = one f32 vreg
DESIRED_TILE_ROWS = 2048               # 2048 x 128 f32 = 1 MiB per input block


def _cdiv(a, b):
    return -(-a // b)


def _mse_sum_kernel(s_ref, t_ref, o_ref, acc_ref, *,
                    tile_rows, total_rows, steps_per_shard, need_row_mask):
    i = pl.program_id(1)

    @pl.when(i == 0)
    def _():
        acc_ref[...] = jnp.zeros_like(acc_ref)

    d = s_ref[...].astype(jnp.float32) - t_ref[...].astype(jnp.float32)
    d2 = d * d

    if need_row_mask:
        # Zero out rows past the valid range (partial last block and, for the
        # sharded v7x path, the clamped duplicate block of an odd block count).
        gblock = pl.program_id(0) * steps_per_shard + i
        row_ids = gblock * tile_rows + jax.lax.broadcasted_iota(
            jnp.int32, (tile_rows, LANES), 0)
        d2 = jnp.where(row_ids < total_rows, d2, 0.0)

    # Fold (tile_rows, 128) -> (8, 128) with cheap VPU adds; keep the expensive
    # cross-lane reduction for the epilogue.
    acc_ref[...] += jnp.sum(
        d2.reshape(tile_rows // SUBLANES, SUBLANES, LANES), axis=0)

    @pl.when(i == pl.num_programs(1) - 1)
    def _():
        o_ref[...] = jnp.sum(acc_ref[...], keepdims=True)


def _num_shards():
    # Shard across TensorCores only on v7x (2 TCs/chip); 1 elsewhere.
    try:
        kind = jax.devices()[0].device_kind.lower()
    except Exception:  # pragma: no cover - defensive
        return 1
    return 2 if "v7" in kind else 1


@jax.jit
def hint_loss(feature_s, feature_t):
    """MSE loss (mean reduction) between two same-shaped feature tensors."""
    assert feature_s.shape == feature_t.shape
    numel = feature_s.size

    # Flatten in native dtype (no upcast here; cast happens on the VPU).
    s_flat = feature_s.reshape(-1)
    t_flat = feature_t.reshape(-1)

    # Round up to a whole number of (8, 128) vregs.  For typical NCHW feature
    # maps numel % 1024 == 0 and no pad (hence no HBM copy) is materialized.
    padded = _cdiv(numel, VREG_ELEMS) * VREG_ELEMS
    pad = padded - numel
    if pad:
        # Rare ragged case: pad <= 1023 zeros (zeros contribute 0 to the sum).
        s_flat = jnp.pad(s_flat, (0, pad))
        t_flat = jnp.pad(t_flat, (0, pad))

    rows = padded // LANES               # multiple of 8
    s2d = s_flat.reshape(rows, LANES)
    t2d = t_flat.reshape(rows, LANES)

    tile_rows = min(DESIRED_TILE_ROWS, rows)   # == rows, or a multiple of 8
    num_blocks = _cdiv(rows, tile_rows)

    num_shards = min(_num_shards(), num_blocks)
    spb = _cdiv(num_blocks, num_shards)        # inner grid steps per shard
    need_row_mask = (num_shards * spb * tile_rows) != rows

    if num_shards == 1:
        in_map = lambda c, i: (i, 0)
    else:
        last_block = num_blocks - 1
        # Clamp so the generated DMA stays in bounds; the duplicate block's
        # contribution is zeroed by the in-kernel row mask.
        in_map = lambda c, i: (jnp.minimum(c * spb + i, last_block), 0)

    kernel = functools.partial(
        _mse_sum_kernel,
        tile_rows=tile_rows,
        total_rows=rows,
        steps_per_shard=spb,
        need_row_mask=need_row_mask,
    )

    partial_sums = pl.pallas_call(
        kernel,
        out_shape=jax.ShapeDtypeStruct((num_shards, 1), jnp.float32),
        grid_spec=pltpu.PrefetchScalarGridSpec(
            num_scalar_prefetch=0,
            grid=(num_shards, spb),
            in_specs=[
                pl.BlockSpec((tile_rows, LANES), in_map),
                pl.BlockSpec((tile_rows, LANES), in_map),
            ],
            out_specs=pl.BlockSpec((1, 1), lambda c, i: (c, 0)),
            scratch_shapes=[pltpu.VMEM((SUBLANES, LANES), jnp.float32)],
        ),
        compiler_params=pltpu.CompilerParams(
            dimension_semantics=("parallel", "arbitrary"),
        ),
    )(s2d, t2d)

    # Mean reduction over the original (unpadded) element count.
    return (jnp.sum(partial_sums) / numel).astype(jnp.float32)


if __name__ == "__main__":
    key = jax.random.PRNGKey(0)
    k_s, k_t = jax.random.split(key)

    # Small feature maps consistent with a distillation hint (NCHW).
    feature_s = jax.random.normal(k_s, (2, 4, 16, 16), dtype=jnp.float32)
    feature_t = jax.random.normal(k_t, (2, 4, 16, 16), dtype=jnp.float32)

    loss = hint_loss(feature_s, feature_t)
    jax.block_until_ready(loss)
    ref = jnp.mean((feature_s - feature_t) ** 2)
    assert jnp.allclose(loss, ref, rtol=1e-5, atol=1e-6), (loss, ref)

    # Secondary self-check exercising the multi-block + ragged-tail mask path.
    k_s2, k_t2 = jax.random.split(jax.random.PRNGKey(0), 2)
    fs2 = jax.random.normal(k_s2, (8, 32, 35, 37), dtype=jnp.float32)
    ft2 = jax.random.normal(k_t2, (8, 32, 35, 37), dtype=jnp.float32)
    loss2 = hint_loss(fs2, ft2)
    jax.block_until_ready(loss2)
    ref2 = jnp.mean((fs2 - ft2) ** 2)
    assert jnp.allclose(loss2, ref2, rtol=1e-5, atol=1e-6), (loss2, ref2)

    print("KERNEL_OK")
</pallas_src>

<mosaic_0001>
module attributes {stable_mosaic.version = 11 : i64} {
  func.func @_mse_sum_kernel(%arg0: i32, %arg1: i32, %arg2: memref<16x128xf32, #tpu.memory_space<vmem>>, %arg3: memref<16x128xf32, #tpu.memory_space<vmem>>, %arg4: memref<1x1xf32, #tpu.memory_space<vmem>>, %arg5: memref<8x128xf32, #tpu.memory_space<vmem>>) attributes {dimension_semantics = [#tpu.dimension_semantics<parallel>, #tpu.dimension_semantics<arbitrary>], iteration_bounds = array<i64: 1, 1>, scalar_prefetch = 0 : i64, scratch_operands = 1 : i64, tpu.core_type = #tpu.core_type<tc>, window_params = [{transform_indices = @transform_0, window_bounds = array<i64: 16, 128>}, {transform_indices = @transform_1, window_bounds = array<i64: 16, 128>}, {transform_indices = @transform_2, window_bounds = array<i64: 1, 1>}]} {
    %c0_i32 = arith.constant 0 : i32
    %0 = arith.cmpi eq, %arg1, %c0_i32 : i32
    %1 = arith.extui %0 : i1 to i32
    %c0_i32_0 = arith.constant 0 : i32
    %2 = arith.cmpi ne, %1, %c0_i32_0 : i32
    scf.if %2 {
      %cst_10 = arith.constant 0.000000e+00 : f32
      %15 = vector.broadcast %cst_10 : f32 to vector<8x128xf32>
      %c0_11 = arith.constant 0 : index
      %c0_12 = arith.constant 0 : index
      %16 = vector.load %arg5[%c0_11, %c0_12] : memref<8x128xf32, #tpu.memory_space<vmem>>, vector<8x128xf32>
      tpu.vector_store %arg5[%c0_11, %c0_12], %15 {strides = array<i32>} : memref<8x128xf32, #tpu.memory_space<vmem>>, vector<8x128xf32>,
    } else {
    }
    %c0 = arith.constant 0 : index
    %c0_1 = arith.constant 0 : index
    %3 = vector.load %arg2[%c0, %c0_1] : memref<16x128xf32, #tpu.memory_space<vmem>>, vector<16x128xf32>
    %c0_2 = arith.constant 0 : index
    %c0_3 = arith.constant 0 : index
    %4 = vector.load %arg3[%c0_2, %c0_3] : memref<16x128xf32, #tpu.memory_space<vmem>>, vector<16x128xf32>
    %5 = arith.subf %3, %4 : vector<16x128xf32>
    %6 = arith.mulf %5, %5 : vector<16x128xf32>
    %c0_4 = arith.constant 0 : index
    %c0_5 = arith.constant 0 : index
    %7 = vector.load %arg5[%c0_4, %c0_5] : memref<8x128xf32, #tpu.memory_space<vmem>>, vector<8x128xf32>
    %8 = vector.shape_cast %6 : vector<16x128xf32> to vector<2x8x128xf32>
    %cst = arith.constant dense<0.000000e+00> : vector<8x128xf32>
    %9 = vector.multi_reduction <add>, %8, %cst [0] : vector<2x8x128xf32> to vector<8x128xf32>
    %10 = arith.addf %7, %9 : vector<8x128xf32>
    %c0_6 = arith.constant 0 : index
    %c0_7 = arith.constant 0 : index
    %11 = vector.load %arg5[%c0_6, %c0_7] : memref<8x128xf32, #tpu.memory_space<vmem>>, vector<8x128xf32>
    tpu.vector_store %arg5[%c0_6, %c0_7], %10 {strides = array<i32>} : memref<8x128xf32, #tpu.memory_space<vmem>>, vector<8x128xf32>,
    %c0_i32_8 = arith.constant 0 : i32
    %12 = arith.cmpi eq, %arg1, %c0_i32_8 : i32
    %13 = arith.extui %12 : i1 to i32
    %c0_i32_9 = arith.constant 0 : i32
    %14 = arith.cmpi ne, %13, %c0_i32_9 : i32
    scf.if %14 {
      %c0_10 = arith.constant 0 : index
      %c0_11 = arith.constant 0 : index
      %15 = vector.load %arg5[%c0_10, %c0_11] : memref<8x128xf32, #tpu.memory_space<vmem>>, vector<8x128xf32>
      %16 = vector.shape_cast %15 : vector<8x128xf32> to vector<1x8x128xf32>
      %cst_12 = arith.constant dense<0.000000e+00> : vector<1xf32>
      %17 = vector.multi_reduction <add>, %16, %cst_12 [1, 2] : vector<1x8x128xf32> to vector<1xf32>
      %18 = vector.shape_cast %17 : vector<1xf32> to vector<1x1x1xf32>
      %19 = vector.extract %18[0, 0, 0] : f32 from vector<1x1x1xf32>
      %20 = vector.broadcast %19 : f32 to vector<1x1xf32>
      %c0_13 = arith.constant 0 : index
      %c0_14 = arith.constant 0 : index
      %21 = vector.load %arg4[%c0_13, %c0_14] : memref<1x1xf32, #tpu.memory_space<vmem>>, vector<1x1xf32>
      tpu.vector_store %arg4[%c0_13, %c0_14], %20 {strides = array<i32>} : memref<1x1xf32, #tpu.memory_space<vmem>>, vector<1x1xf32>,
    } else {
    }
    return
  }
  func.func @transform_0(%arg0: i32, %arg1: i32) -> (i32, i32) {
    %c0_i32 = arith.constant 0 : i32
    %c0_i32_0 = arith.constant 0 : i32
    return %arg1, %c0_i32 : i32, i32
  }
  func.func @transform_1(%arg0: i32, %arg1: i32) -> (i32, i32) {
    %c0_i32 = arith.constant 0 : i32
    %c0_i32_0 = arith.constant 0 : i32
    return %arg1, %c0_i32 : i32, i32
  }
  func.func @transform_2(%arg0: i32, %arg1: i32) -> (i32, i32) {
    %c0_i32 = arith.constant 0 : i32
    %c0_i32_0 = arith.constant 0 : i32
    return %arg0, %c0_i32 : i32, i32
  }
}

</mosaic_0001>

<bundles_post_ra>
// kernel: hint_loss.1
= control target key start
LH: loop header
LB: loop body
LE: loop exit
PB: predicated region body
PF: predicated region fallthrough
CT: control target
= control target key end

     0   :  { %s126_s0 = inlined_call_operand.vmem [shape: f32[16,128], index: 0, kind: input, shape index: {}]   ;;  %s127_s1 = inlined_call_operand.vmem [shape: f32[16,128], index: 1, kind: input, shape index: {}]   ;;  %s128_s2 = inlined_call_operand.hbm [shape: f32[1,1], index: 2, kind: output, shape index: {}]  }
   0x1   :  { %v17_v0 = vld [vmem:[%s126_s0] sm:$0xff]  ;;  %v18_v1 = vld [vmem:[%s126_s0 + $0x8] sm:$0xff] }
   0x2   :  { %v19_v2 = vld [vmem:[%s127_s1] sm:$0xff]  ;;  %v20_v3 = vld [vmem:[%s127_s1 + $0x8] sm:$0xff] }
   0x3   :  { %v21_v4 = vsub.f32 %v17_v0, %v19_v2 }
   0x4   :  { %7 = vsyncpa [#allocation4], 0  ;;  %v22_v5 = vsub.f32 %v18_v1, %v20_v3  ;;  %s86_s0 = smov [#allocation3]   ;;  %vm43_vm0 = vcmask 0  }
   0x5   :  { %v23_v6 = vmul.f32 %v21_v4, %v21_v4  ;;  %s51_s17 = sshll.u32 %s86_s0, 4  ;;  %s52_s17 = int_to_ptr.vmem [resolvable:$true] %s51_s17 }
   0x6   :  { %v24_v7 = vmul.f32 %v22_v5, %v22_v5  ;;  %s62_s1 = scalar_lea.vmem %s52_s17, 16  ;;  %s66_s19 = scalar_lea.vmem %s52_s17, 32 }
   0x7   :  { %p63_p0 = scmp.ne.s32.totalorder %s52_s17, %s62_s1  ;;  %p67_p1 = scmp.lt.s32.totalorder %s52_s17, %s52_s17 }
   0x8   :  { %v26_v8 = vadd.f32 %v24_v7, %v23_v6  ;;  %p68_p2 = scmp.lt.s32.totalorder %s66_s19, %s62_s1 }
   0xa   :  { %33 = vadd.xlane.f32.xlu0 %v26_v8  ;;  %p69_p3 = por %p68_p2, %p67_p1 }
   0xc   :  { %p70_p4 = pnand %p69_p3, %p63_p0 }
  0x97   :  { %v34_v9 = vpop.xlane.xlu0 %33 }
  0x98   :  { %v35_v10 = vrot.slane %v34_v9, 4 }
  0x9a   :  { %v36_v11 = vadd.f32 %v35_v10, %v34_v9 }
  0x9c   :  { %v37_v12 = vrot.slane %v36_v11, 2 }
  0x9e   :  { %v38_v13 = vadd.f32 %v37_v12, %v36_v11 }
  0xa0   :  { %v39_v14 = vrot.slane %v38_v13, 1 }
  0xa2   :  { %v40_v15 = vadd.f32 %v39_v14, %v38_v13 }
  0xa4   :  { %59 = vpush %v40_v15 }
  0xd5   :  { %s60_s18 = spop %59 }
  0xd6   :  { %v42_v16 = vstv %s60_s18 }
  0xd7   :  { %44 = vst.msk [vmem:[#allocation3] sm:$0x1] %vm43_vm0, %v42_v16 }
  0xd8   :  { %73 = shalt.err (!%p70_p4)
}
  0xd9   :  { %s74_s22 = scalar_lea.hbm %s128_s2, 16 }
  0xda   :  { %p75_p5 = scmp.ne.s32.totalorder %s128_s2, %s74_s22  ;;  %p78_p6 = scmp.lt.u32.totalorder %s74_s22, %s128_s2 }
  0xdc   :  { %p80_p7 = pnand %p78_p6, %p75_p5 }
  0xde   :  { %83 = shalt.err (!%p80_p7)
}
  0xdf   :  { %54 = dma.vmem_to_hbm [thread:$0]  %s52_s17, 16, %s128_s2, [#allocation4]  }
  0xe0   :  { %84 = dma.done.wait [#allocation4], 16  }
  0xe1   :  { %85 = vsyncadd [#allocation4], 4294967280 }
  0xe2   :  { %58 = vsyncpa [#allocation4], 1 }

</bundles_post_ra>
